<compile_context>
chip_gen: v6e
topology: v6e:2x2x1
jax: 0.10.0
libtpu: 0.0.40
codegen_flags: <defaults>
</compile_context>

<pallas_src>
import functools

import jax
import jax.numpy as jnp
from jax.experimental import pallas as pl
from jax.experimental.pallas import tpu as pltpu


def _erf(x):
    # Abramowitz & Stegun 7.1.26 rational approximation (|err| <= 1.5e-7),
    # built only from ops guaranteed to lower on the TPU VPU/EUP.
    a1, a2, a3, a4, a5 = (0.254829592, -0.284496736, 1.421413741,
                          -1.453152027, 1.061405429)
    p = 0.3275911
    sign = jnp.where(x < 0.0, -1.0, 1.0)
    ax = jnp.abs(x)
    d = 1.0 + p * ax
    # Seed the reciprocal on the EUP (frees the VALU slot); one Newton step
    # (2 cheap VALU ops) restores ~f32 accuracy so results stay within the
    # exact-erf tolerance.
    t = pl.reciprocal(d, approx=True)
    t = t * (2.0 - d * t)
    poly = ((((a5 * t + a4) * t + a3) * t + a2) * t + a1) * t
    return sign * (1.0 - poly * jnp.exp(-ax * ax))


def _gelu_exact(x):
    # Matches torch.nn.GELU() default (erf-based, not tanh approximation).
    return 0.5 * x * (1.0 + _erf(x * 0.7071067811865476))


def _ffn_kernel(x_ref, w1_ref, b1_ref, w2_ref, b2_ref, o_ref, acc_ref):
    j = pl.program_id(1)  # hidden-dim tile index (reduction axis, last in grid)

    @pl.when(j == 0)
    def _():
        acc_ref[...] = jnp.zeros_like(acc_ref)

    # fc1 partial over this hidden tile.  Operands in their native dtype,
    # f32 accumulation on the MXU.
    h = jnp.dot(x_ref[...], w1_ref[...], preferred_element_type=jnp.float32)
    h = h + b1_ref[...].astype(jnp.float32)

    # GELU (exact erf), computed in f32.
    h = _gelu_exact(h)
    # Dropout: identity at inference.

    # fc2 partial: feed the MXU in the weight dtype, accumulate in f32.
    acc_ref[...] += jnp.dot(h.astype(w2_ref.dtype), w2_ref[...],
                            preferred_element_type=jnp.float32)

    @pl.when(j == pl.num_programs(1) - 1)
    def _():
        o_ref[...] = (acc_ref[...]
                      + b2_ref[...].astype(jnp.float32)).astype(o_ref.dtype)


def _choose_tile(total, preferred, align):
    """Largest divisor of `total` that is <= preferred and a multiple of align;
    falls back to the full extent (block == array dim is always legal)."""
    if total <= preferred:
        return total
    t = (preferred // align) * align
    while t >= align:
        if total % t == 0:
            return t
        t -= align
    return total


@functools.partial(jax.jit, static_argnames=("block_m", "tile_h"))
def positionwise_feed_forward(x, w1, b1, w2, b2, *, block_m=256, tile_h=2048):
    """x: [B, S, D]; w1: [D, H]; b1: [H]; w2: [H, D]; b2: [D] (torch weight.T)."""
    B, S, D = x.shape
    H = w1.shape[1]
    M = B * S

    sub = 16 if x.dtype == jnp.bfloat16 else 8     # sublane tile per dtype
    bm = _choose_tile(M, block_m, sub)
    th = _choose_tile(H, tile_h, 128)

    x2d = x.reshape(M, D)
    b1_2d = b1.reshape(1, H)
    b2_2d = b2.reshape(1, D)

    grid = (M // bm, H // th)

    # Explicit VMEM budget for the chosen tiles (double-buffered pipeline
    # blocks + f32 accumulator + f32 GELU intermediate headroom).
    bx = x.dtype.itemsize
    bw = w1.dtype.itemsize
    vmem_needed = (
        2 * bm * D * bx                 # x tile (resident across h steps)
        + 2 * (D * th + th) * bw        # W1 + b1 tiles
        + 2 * (th * D + D) * bw         # W2 + b2 tiles
        + 2 * bm * D * bx               # out tile
        + bm * D * 4                    # f32 accumulator scratch
        + 2 * bm * th * 4               # fc1/GELU f32 intermediate headroom
    )
    vmem_limit = int(min(max(vmem_needed + (8 << 20), 32 << 20), 128 << 20))

    cost = pl.CostEstimate(
        flops=4 * M * D * H,            # two matmuls: 2*M*D*H each
        transcendentals=2 * M * H,      # exp + EUP reciprocal per GELU element
        bytes_accessed=(x2d.size * bx + w1.size * bw + b1.size * bw
                        + w2.size * bw + b2.size * bw + M * D * bx),
    )

    out2d = pl.pallas_call(
        _ffn_kernel,
        out_shape=jax.ShapeDtypeStruct((M, D), x.dtype),
        grid_spec=pltpu.PrefetchScalarGridSpec(
            num_scalar_prefetch=0,
            grid=grid,
            in_specs=[
                pl.BlockSpec((bm, D), lambda i, j: (i, 0)),   # x (constant over j)
                pl.BlockSpec((D, th), lambda i, j: (0, j)),   # W1 tile
                pl.BlockSpec((1, th), lambda i, j: (0, j)),   # b1 tile
                pl.BlockSpec((th, D), lambda i, j: (j, 0)),   # W2 tile
                pl.BlockSpec((1, D), lambda i, j: (0, 0)),    # b2
            ],
            out_specs=pl.BlockSpec((bm, D), lambda i, j: (i, 0)),
            scratch_shapes=[pltpu.VMEM((bm, D), jnp.float32)],
        ),
        compiler_params=pltpu.CompilerParams(
            dimension_semantics=("parallel", "arbitrary"),
            vmem_limit_bytes=vmem_limit,
        ),
        cost_estimate=cost,
    )(x2d, w1, b1_2d, w2, b2_2d)

    return out2d.reshape(B, S, D)


def init_params(key, dim, mlp_dim, dtype=jnp.float32):
    """Deterministic init mirroring torch.nn.Linear defaults."""
    k1, k2, k3, k4 = jax.random.split(key, 4)
    bound1 = 1.0 / (dim ** 0.5)
    bound2 = 1.0 / (mlp_dim ** 0.5)
    # stored [in, out] == torch weight.T
    w1 = jax.random.uniform(k1, (dim, mlp_dim), dtype, -bound1, bound1)
    b1 = jax.random.uniform(k2, (mlp_dim,), dtype, -bound1, bound1)
    w2 = jax.random.uniform(k3, (mlp_dim, dim), dtype, -bound2, bound2)
    b2 = jax.random.uniform(k4, (dim,), dtype, -bound2, bound2)
    return w1, b1, w2, b2


def _ref_ffn(x, w1, b1, w2, b2):
    # Pure-JAX reference (same GELU semantics: exact erf).
    xf = x.reshape(-1, x.shape[-1]).astype(jnp.float32)
    h = jax.nn.gelu(xf @ w1.astype(jnp.float32) + b1.astype(jnp.float32),
                    approximate=False)
    o = h @ w2.astype(jnp.float32) + b2.astype(jnp.float32)
    return o.reshape(x.shape).astype(x.dtype)


if __name__ == "__main__":
    # Test 1: small shapes from the module spec (single M tile, single H tile).
    kx, kp = jax.random.split(jax.random.PRNGKey(0))
    B, S, dim, mlp_dim = 2, 8, 32, 64
    x = jax.random.normal(kx, (B, S, dim), jnp.float32)
    w1, b1, w2, b2 = init_params(kp, dim, mlp_dim)

    out = jax.block_until_ready(positionwise_feed_forward(x, w1, b1, w2, b2))
    ref = _ref_ffn(x, w1, b1, w2, b2)
    assert out.shape == (B, S, dim)
    assert jnp.allclose(out, ref, atol=1e-4, rtol=1e-4)

    # Test 2: exercises the tiled grid (2 M tiles x 2 H tiles, 128-lane blocks)
    # and the f32 accumulator init/writeback path.
    kx2, kp2 = jax.random.split(jax.random.PRNGKey(1))
    B2, S2, dim2, mlp2 = 2, 128, 128, 256
    x2 = jax.random.normal(kx2, (B2, S2, dim2), jnp.float32)
    p2 = init_params(kp2, dim2, mlp2)
    out2 = jax.block_until_ready(
        positionwise_feed_forward(x2, *p2, block_m=128, tile_h=128))
    ref2 = _ref_ffn(x2, *p2)
    assert jnp.allclose(out2, ref2, atol=1e-3, rtol=1e-3)

    print("KERNEL_OK")
</pallas_src>

<mosaic_0001>
module attributes {stable_mosaic.version = 11 : i64} {
  func.func @_ffn_kernel(%arg0: i32, %arg1: i32, %arg2: memref<16x32xf32, #tpu.memory_space<vmem>>, %arg3: memref<32x64xf32, #tpu.memory_space<vmem>>, %arg4: memref<1x64xf32, #tpu.memory_space<vmem>>, %arg5: memref<64x32xf32, #tpu.memory_space<vmem>>, %arg6: memref<1x32xf32, #tpu.memory_space<vmem>>, %arg7: memref<16x32xf32, #tpu.memory_space<vmem>>, %arg8: memref<16x32xf32, #tpu.memory_space<vmem>>) attributes {dimension_semantics = [#tpu.dimension_semantics<parallel>, #tpu.dimension_semantics<arbitrary>], iteration_bounds = array<i64: 1, 1>, scalar_prefetch = 0 : i64, scratch_operands = 1 : i64, tpu.core_type = #tpu.core_type<tc>, window_params = [{transform_indices = @transform_0, window_bounds = array<i64: 16, 32>}, {transform_indices = @transform_1, window_bounds = array<i64: 32, 64>}, {transform_indices = @transform_2, window_bounds = array<i64: 1, 64>}, {transform_indices = @transform_3, window_bounds = array<i64: 64, 32>}, {pipeline_mode = #tpu.pipeline_mode<synchronous>, transform_indices = @transform_4, window_bounds = array<i64: 1, 32>}, {transform_indices = @transform_5, window_bounds = array<i64: 16, 32>}]} {
    %c0_i32 = arith.constant 0 : i32
    %0 = arith.cmpi eq, %arg1, %c0_i32 : i32
    %1 = arith.extui %0 : i1 to i32
    %c0_i32_0 = arith.constant 0 : i32
    %2 = arith.cmpi ne, %1, %c0_i32_0 : i32
    scf.if %2 {
      %cst_31 = arith.constant 0.000000e+00 : f32
      %61 = vector.broadcast %cst_31 : f32 to vector<16x32xf32>
      %c0_32 = arith.constant 0 : index
      %c0_33 = arith.constant 0 : index
      %62 = vector.load %arg8[%c0_32, %c0_33] : memref<16x32xf32, #tpu.memory_space<vmem>>, vector<16x32xf32>
      tpu.vector_store %arg8[%c0_32, %c0_33], %61 {strides = array<i32>} : memref<16x32xf32, #tpu.memory_space<vmem>>, vector<16x32xf32>,
    } else {
    }
    %c0 = arith.constant 0 : index
    %c0_1 = arith.constant 0 : index
    %3 = vector.load %arg2[%c0, %c0_1] : memref<16x32xf32, #tpu.memory_space<vmem>>, vector<16x32xf32>
    %c0_2 = arith.constant 0 : index
    %c0_3 = arith.constant 0 : index
    %4 = vector.load %arg3[%c0_2, %c0_3] : memref<32x64xf32, #tpu.memory_space<vmem>>, vector<32x64xf32>
    %cst = arith.constant dense<0.000000e+00> : vector<16x64xf32>
    %5 = tpu.matmul %3, %4, %cst {dimension_numbers = #tpu.dot_dimension_numbers<[1], [0], [0], [1], [0, 0, 1, 1], [], []>} : vector<16x32xf32>, vector<32x64xf32>, vector<16x64xf32> -> vector<16x64xf32>
    %c0_4 = arith.constant 0 : index
    %c0_5 = arith.constant 0 : index
    %6 = vector.load %arg4[%c0_4, %c0_5] : memref<1x64xf32, #tpu.memory_space<vmem>>, vector<1x64xf32>
    %7 = vector.broadcast %6 : vector<1x64xf32> to vector<16x64xf32>
    %8 = arith.addf %5, %7 : vector<16x64xf32>
    %cst_6 = arith.constant 5.000000e-01 : f32
    %9 = vector.broadcast %cst_6 : f32 to vector<16x64xf32>
    %10 = arith.mulf %9, %8 : vector<16x64xf32>
    %cst_7 = arith.constant 0.707106769 : f32
    %11 = vector.broadcast %cst_7 : f32 to vector<16x64xf32>
    %12 = arith.mulf %8, %11 : vector<16x64xf32>
    %cst_8 = arith.constant 0.000000e+00 : f32
    %13 = vector.broadcast %cst_8 : f32 to vector<16x64xf32>
    %14 = arith.cmpf olt, %12, %13 : vector<16x64xf32>
    %cst_9 = arith.constant -1.000000e+00 : f32
    %cst_10 = arith.constant 1.000000e+00 : f32
    %15 = vector.broadcast %cst_9 : f32 to vector<16x64xf32>
    %16 = vector.broadcast %cst_10 : f32 to vector<16x64xf32>
    %17 = arith.select %14, %15, %16 : vector<16x64xi1>, vector<16x64xf32>
    %18 = math.absf %12 : vector<16x64xf32>
    %cst_11 = arith.constant 0.327591091 : f32
    %19 = vector.broadcast %cst_11 : f32 to vector<16x64xf32>
    %20 = arith.mulf %19, %18 : vector<16x64xf32>
    %cst_12 = arith.constant 1.000000e+00 : f32
    %21 = vector.broadcast %cst_12 : f32 to vector<16x64xf32>
    %22 = arith.addf %21, %20 : vector<16x64xf32>
    %23 = tpu.reciprocal %22 {approx = true} : vector<16x64xf32> -> vector<16x64xf32>
    %24 = arith.mulf %22, %23 : vector<16x64xf32>
    %cst_13 = arith.constant 2.000000e+00 : f32
    %25 = vector.broadcast %cst_13 : f32 to vector<16x64xf32>
    %26 = arith.subf %25, %24 : vector<16x64xf32>
    %27 = arith.mulf %23, %26 : vector<16x64xf32>
    %cst_14 = arith.constant 1.06140542 : f32
    %28 = vector.broadcast %cst_14 : f32 to vector<16x64xf32>
    %29 = arith.mulf %28, %27 : vector<16x64xf32>
    %cst_15 = arith.constant -1.45315206 : f32
    %30 = vector.broadcast %cst_15 : f32 to vector<16x64xf32>
    %31 = arith.addf %29, %30 : vector<16x64xf32>
    %32 = arith.mulf %31, %27 : vector<16x64xf32>
    %cst_16 = arith.constant 1.42141378 : f32
    %33 = vector.broadcast %cst_16 : f32 to vector<16x64xf32>
    %34 = arith.addf %32, %33 : vector<16x64xf32>
    %35 = arith.mulf %34, %27 : vector<16x64xf32>
    %cst_17 = arith.constant -0.284496725 : f32
    %36 = vector.broadcast %cst_17 : f32 to vector<16x64xf32>
    %37 = arith.addf %35, %36 : vector<16x64xf32>
    %38 = arith.mulf %37, %27 : vector<16x64xf32>
    %cst_18 = arith.constant 0.254829586 : f32
    %39 = vector.broadcast %cst_18 : f32 to vector<16x64xf32>
    %40 = arith.addf %38, %39 : vector<16x64xf32>
    %41 = arith.mulf %40, %27 : vector<16x64xf32>
    %cst_19 = arith.constant 0.000000e+00 : f32
    %42 = vector.broadcast %cst_19 : f32 to vector<16x64xf32>
    %43 = arith.subf %42, %18 : vector<16x64xf32>
    %44 = arith.mulf %43, %18 : vector<16x64xf32>
    %45 = math.exp %44 : vector<16x64xf32>
    %46 = arith.mulf %41, %45 : vector<16x64xf32>
    %cst_20 = arith.constant 1.000000e+00 : f32
    %47 = vector.broadcast %cst_20 : f32 to vector<16x64xf32>
    %48 = arith.subf %47, %46 : vector<16x64xf32>
    %49 = arith.mulf %17, %48 : vector<16x64xf32>
    %cst_21 = arith.constant 1.000000e+00 : f32
    %50 = vector.broadcast %cst_21 : f32 to vector<16x64xf32>
    %51 = arith.addf %50, %49 : vector<16x64xf32>
    %52 = arith.mulf %10, %51 : vector<16x64xf32>
    %c0_22 = arith.constant 0 : index
    %c0_23 = arith.constant 0 : index
    %53 = vector.load %arg8[%c0_22, %c0_23] : memref<16x32xf32, #tpu.memory_space<vmem>>, vector<16x32xf32>
    %c0_24 = arith.constant 0 : index
    %c0_25 = arith.constant 0 : index
    %54 = vector.load %arg5[%c0_24, %c0_25] : memref<64x32xf32, #tpu.memory_space<vmem>>, vector<64x32xf32>
    %cst_26 = arith.constant dense<0.000000e+00> : vector<16x32xf32>
    %55 = tpu.matmul %52, %54, %cst_26 {dimension_numbers = #tpu.dot_dimension_numbers<[1], [0], [0], [1], [0, 0, 1, 1], [], []>} : vector<16x64xf32>, vector<64x32xf32>, vector<16x32xf32> -> vector<16x32xf32>
    %56 = arith.addf %53, %55 : vector<16x32xf32>
    %c0_27 = arith.constant 0 : index
    %c0_28 = arith.constant 0 : index
    %57 = vector.load %arg8[%c0_27, %c0_28] : memref<16x32xf32, #tpu.memory_space<vmem>>, vector<16x32xf32>
    tpu.vector_store %arg8[%c0_27, %c0_28], %56 {strides = array<i32>} : memref<16x32xf32, #tpu.memory_space<vmem>>, vector<16x32xf32>,
    %c0_i32_29 = arith.constant 0 : i32
    %58 = arith.cmpi eq, %arg1, %c0_i32_29 : i32
    %59 = arith.extui %58 : i1 to i32
    %c0_i32_30 = arith.constant 0 : i32
    %60 = arith.cmpi ne, %59, %c0_i32_30 : i32
    scf.if %60 {
      %c0_31 = arith.constant 0 : index
      %c0_32 = arith.constant 0 : index
      %61 = vector.load %arg8[%c0_31, %c0_32] : memref<16x32xf32, #tpu.memory_space<vmem>>, vector<16x32xf32>
      %c0_33 = arith.constant 0 : index
      %c0_34 = arith.constant 0 : index
      %62 = vector.load %arg6[%c0_33, %c0_34] : memref<1x32xf32, #tpu.memory_space<vmem>>, vector<1x32xf32>
      %63 = vector.broadcast %62 : vector<1x32xf32> to vector<16x32xf32>
      %64 = arith.addf %61, %63 : vector<16x32xf32>
      %c0_35 = arith.constant 0 : index
      %c0_36 = arith.constant 0 : index
      %65 = vector.load %arg7[%c0_35, %c0_36] : memref<16x32xf32, #tpu.memory_space<vmem>>, vector<16x32xf32>
      tpu.vector_store %arg7[%c0_35, %c0_36], %64 {strides = array<i32>} : memref<16x32xf32, #tpu.memory_space<vmem>>, vector<16x32xf32>,
    } else {
    }
    return
  }
  func.func @transform_0(%arg0: i32, %arg1: i32) -> (i32, i32) {
    %c0_i32 = arith.constant 0 : i32
    %c0_i32_0 = arith.constant 0 : i32
    return %arg0, %c0_i32 : i32, i32
  }
  func.func @transform_1(%arg0: i32, %arg1: i32) -> (i32, i32) {
    %c0_i32 = arith.constant 0 : i32
    %c0_i32_0 = arith.constant 0 : i32
    return %c0_i32, %arg1 : i32, i32
  }
  func.func @transform_2(%arg0: i32, %arg1: i32) -> (i32, i32) {
    %c0_i32 = arith.constant 0 : i32
    %c0_i32_0 = arith.constant 0 : i32
    return %c0_i32, %arg1 : i32, i32
  }
  func.func @transform_3(%arg0: i32, %arg1: i32) -> (i32, i32) {
    %c0_i32 = arith.constant 0 : i32
    %c0_i32_0 = arith.constant 0 : i32
    return %arg1, %c0_i32 : i32, i32
  }
  func.func @transform_4(%arg0: i32, %arg1: i32) -> (i32, i32) {
    %c0_i32 = arith.constant 0 : i32
    %c0_i32_0 = arith.constant 0 : i32
    %c0_i32_1 = arith.constant 0 : i32
    return %c0_i32, %c0_i32_0 : i32, i32
  }
  func.func @transform_5(%arg0: i32, %arg1: i32) -> (i32, i32) {
    %c0_i32 = arith.constant 0 : i32
    %c0_i32_0 = arith.constant 0 : i32
    return %arg0, %c0_i32 : i32, i32
  }
}

</mosaic_0001>

<bundles_post_ra>
// kernel: positionwise_feed_forward.1
= control target key start
LH: loop header
LB: loop body
LE: loop exit
PB: predicated region body
PF: predicated region fallthrough
CT: control target
= control target key end

     0   :  { %vm25_vm0 = vcmask 261120   ;;  %s490_s0 = inlined_call_operand.vmem [shape: f32[16,32], index: 0, kind: input, shape index: {}]   ;;  %s491_s1 = inlined_call_operand.vmem [shape: f32[32,64], index: 1, kind: input, shape index: {}]   ;;  %s492_s2 = inlined_call_operand.vmem [shape: f32[1,64], index: 2, kind: input, shape index: {}]   ;;  %s493_s3 = inlined_call_operand.vmem [shape: f32[64,32], index: 3, kind: input, shape index: {}]   ;;  %s494_s4 = inlined_call_operand.vmem [shape: f32[1,32], index: 4, kind: input, shape index: {}]   ;;  %s495_s5 = inlined_call_operand.hbm [shape: f32[16,32], index: 5, kind: output, shape index: {}]  }
   0x1   :  { %v33_v0 = vld [vmem:[%s491_s1 + $0x18] sm:$0xff]  ;;  %v32_v1 = vld [vmem:[%s491_s1 + $0x10] sm:$0xff]  ;;  %v28_v2 = vld [vmem:[%s490_s0] sm:$0xff] }
   0x2   :  { %331 = vmatprep.subr.mxu0 %v33_v0  ;;  %v31_v3 = vld [vmem:[%s491_s1 + $0x8] sm:$0xff]  ;;  %339 = vmatprep.mubr.msk.f32.mxu0 %vm25_vm0, %v28_v2 }
   0x3   :  { %332 = vmatpush3.msra.mxu0 %v33_v0 }
   0x4   :  { %10 = vsyncpa [#allocation4], 0  ;;  %333 = vmatprep.subr.mxu0 %v32_v1  ;;  %v30_v4 = vld [vmem:[%s491_s1] sm:$0xff]  ;;  %v29_v5 = vld [vmem:[%s490_s0 + $0x8] sm:$0xff]  ;;  %v396_v14 = vmov 0.0   ;;  %v397_v0 = vmov 1.0  }
   0x5   :  { %334 = vmatpush3.msra.mxu0 %v32_v1  ;;  %v190_v6 = vld [vmem:[%s493_s3 + $0x38] sm:$0xff]  ;;  %v189_v7 = vld [vmem:[%s493_s3 + $0x30] sm:$0xff]  ;;  %v188_v8 = vld [vmem:[%s493_s3 + $0x28] sm:$0xff]  ;;  %27 = vst.msk [vmem:[#allocation2 + $0x8] sm:$0xff] %vm25_vm0, %v396_v14  ;;  %vm191_vm3 = vcmask 523264   ;;  %s398_s21 = smov [#allocation3]  }
   0x6   :  { %335 = vmatprep.subr.mxu0 %v31_v3  ;;  %342 = vmatprep.subr.mxu1 %v190_v6  ;;  %v187_v9 = vld [vmem:[%s493_s3 + $0x20] sm:$0xff]  ;;  %v186_v10 = vld [vmem:[%s493_s3 + $0x18] sm:$0xff]  ;;  %v185_v11 = vld [vmem:[%s493_s3 + $0x10] sm:$0xff]  ;;  %26 = vst.msk [vmem:[#allocation2] sm:$0xff] %vm25_vm0, %v396_v14  ;;  %s298_s22 = sshll.u32 %s398_s21, 4  ;;  %s299_s22 = int_to_ptr.vmem [resolvable:$true] %s298_s22 }
   0x7   :  { %336 = vmatpush3.msra.mxu0 %v31_v3  ;;  %343 = vmatpush3.msra.mxu1 %v190_v6  ;;  %v184_v12 = vld [vmem:[%s493_s3 + $0x8] sm:$0xff]  ;;  %v183_v13 = vld [vmem:[%s493_s3] sm:$0xff]  ;;  %s374_s23 = scalar_lea.vmem %s299_s22, 256  ;;  %p379_p1 = scmp.lt.s32.totalorder %s299_s22, %s299_s22 }
   0x8   :  { %337 = vmatprep.subr.mxu0 %v30_v4  ;;  %344 = vmatprep.subr.mxu1 %v189_v7  ;;  %v309_v15 = vld [vmem:[%s492_s2] ss:$0 sm:$0xff]  ;;  %p375_p0 = scmp.ne.s32.totalorder %s299_s22, %s374_s23  ;;  %p380_p2 = scmp.lt.s32.totalorder %s374_s23, %s374_s23 }
   0x9   :  { %338 = vmatpush3.msra.mxu0 %v30_v4  ;;  %345 = vmatpush3.msra.mxu1 %v189_v7 }
   0xa   :  { %340 = vmatmul.mubr.msk.f32.vlgmr.msra.gmra.mxu0 %vm25_vm0, %v29_v5  ;;  %346 = vmatprep.subr.mxu1 %v188_v8  ;;  %p381_p3 = por %p380_p2, %p379_p1 }
   0xb   :  { %347 = vmatpush3.msra.mxu1 %v188_v8 }
   0xc   :  { %348 = vmatprep.subr.mxu1 %v187_v9  ;;  %p382_p4 = pnand %p381_p3, %p375_p0 }
   0xd   :  { %349 = vmatpush3.msra.mxu1 %v187_v9 }
   0xe   :  { %350 = vmatprep.subr.mxu1 %v186_v10 }
   0xf   :  { %351 = vmatpush3.msra.mxu1 %v186_v10 }
  0x10   :  { %352 = vmatprep.subr.mxu1 %v185_v11 }
  0x11   :  { %353 = vmatpush3.msra.mxu1 %v185_v11 }
  0x12   :  { %354 = vmatprep.subr.mxu1 %v184_v12 }
  0x13   :  { %355 = vmatpush3.msra.mxu1 %v184_v12 }
  0x14   :  { %356 = vmatprep.subr.mxu1 %v183_v13 }
  0x15   :  { %357 = vmatpush3.msra.mxu1 %v183_v13  ;;  %v182_v13 = vld [vmem:[#allocation2 + $0x8] sm:$0xff] }
  0xca   :  { %v341_v16 = vpop.f32.mrf.mxu0 }
  0xcb   :  { %v120_v17 = vadd.f32 %v341_v16, %v309_v15 }
  0xcc   :  { %v114_v18 = vpop.f32.mrf.mxu0 }
  0xcd   :  { %v126_v19 = vmul.f32 0.70710677, %v120_v17  ;;  %v115_v20 = vadd.f32 %v309_v15, %v114_v18  ;;  %v124_v10 = vmul.f32 0.5, %v120_v17  ;;  %v181_v15 = vld [vmem:[#allocation2] sm:$0xff] }
  0xcf   :  { %v132_v21 = vand.u32 2147483647, %v126_v19  ;;  %v125_v22 = vmul.f32 0.70710677, %v115_v20  ;;  %vm128_vm1 = vcmp.lt.f32.partialorder %v126_v19, 0.0  ;;  %v123_v8 = vmul.f32 0.5, %v115_v20 }
  0xd0   :  { %v130_v1 = vsel %vm128_vm1, -1.0, %v397_v0  ;;  %v314_v20 = vld [vmem:[%s494_s4] ss:$0 sm:$0xff] }
  0xd1   :  { %v134_v23 = vmul.f32 0.3275911, %v132_v21  ;;  %v131_v24 = vand.u32 2147483647, %v125_v22  ;;  %v164_v28 = vsub.f32 0.0, %v132_v21  ;;  %vm127_vm2 = vcmp.lt.f32.partialorder %v125_v22, 0.0 }
  0xd2   :  { %v129_v5 = vsel %vm127_vm2, -1.0, %v397_v0 }
  0xd3   :  { %v136_v25 = vadd.f32 1.0, %v134_v23  ;;  %v133_v26 = vmul.f32 0.3275911, %v131_v24  ;;  %v163_v31 = vsub.f32 0.0, %v131_v24  ;;  %v166_v34 = vmul.f32 %v164_v28, %v132_v21 }
  0xd5   :  { %366 = vrcp.f32 %v136_v25  ;;  %v135_v27 = vadd.f32 1.0, %v133_v26  ;;  %v165_v38 = vmul.f32 %v163_v31, %v131_v24  ;;  %v169_v40 = vmul.f32 1.442695, %v166_v34 }
  0xd7   :  { %368 = vrcp.f32 %v135_v27  ;;  %v167_v43 = vmul.f32 1.442695, %v165_v38 }
  0xd8   :  { %370 = vpow2.f32 %v169_v40 }
  0xd9   :  { %372 = vpow2.f32 %v167_v43 }
  0xe2   :  { %v367_v29 = vpop.eup %366 }
  0xe3   :  { %v140_v30 = vmul.f32 %v367_v29, %v136_v25 }
  0xe4   :  { %v369_v32 = vpop.eup %368 }
  0xe5   :  { %v142_v33 = vsub.f32 2.0, %v140_v30  ;;  %v139_v35 = vmul.f32 %v369_v32, %v135_v27  ;;  %v371_v58 = vpop.eup %370 }
  0xe6   :  { %v373_v62 = vpop.eup %372 }
  0xe7   :  { %v144_v36 = vmul.f32 %v367_v29, %v142_v33  ;;  %v141_v37 = vsub.f32 2.0, %v139_v35 }
  0xe9   :  { %v146_v39 = vmul.f32 1.0614054, %v144_v36  ;;  %v143_v41 = vmul.f32 %v369_v32, %v141_v37 }
  0xeb   :  { %v148_v42 = vadd.f32 -1.4531521, %v146_v39  ;;  %v145_v44 = vmul.f32 1.0614054, %v143_v41 }
  0xed   :  { %v150_v45 = vmul.f32 %v148_v42, %v144_v36  ;;  %v147_v46 = vadd.f32 -1.4531521, %v145_v44 }
  0xef   :  { %v152_v47 = vadd.f32 1.4214138, %v150_v45  ;;  %v149_v48 = vmul.f32 %v147_v46, %v143_v41 }
  0xf1   :  { %v154_v49 = vmul.f32 %v152_v47, %v144_v36  ;;  %v151_v50 = vadd.f32 1.4214138, %v149_v48 }
  0xf3   :  { %v156_v51 = vadd.f32 -0.28449672, %v154_v49  ;;  %v153_v52 = vmul.f32 %v151_v50, %v143_v41 }
  0xf5   :  { %v158_v53 = vmul.f32 %v156_v51, %v144_v36  ;;  %v155_v54 = vadd.f32 -0.28449672, %v153_v52 }
  0xf7   :  { %v160_v55 = vadd.f32 0.2548296, %v158_v53  ;;  %v157_v56 = vmul.f32 %v155_v54, %v143_v41 }
  0xf9   :  { %v162_v57 = vmul.f32 %v160_v55, %v144_v36  ;;  %v159_v59 = vadd.f32 0.2548296, %v157_v56 }
  0xfb   :  { %v172_v60 = vmul.f32 %v371_v58, %v162_v57  ;;  %v161_v61 = vmul.f32 %v159_v59, %v143_v41 }
  0xfd   :  { %v174_v63 = vsub.f32 1.0, %v172_v60  ;;  %v171_v2 = vmul.f32 %v373_v62, %v161_v61 }
  0xff   :  { %v176_v3 = vmul.f32 %v174_v63, %v130_v1  ;;  %v173_v4 = vsub.f32 1.0, %v171_v2 }
 0x101   :  { %v175_v6 = vmul.f32 %v173_v4, %v129_v5  ;;  %v178_v7 = vadd.f32 1.0, %v176_v3 }
 0x103   :  { %v177_v9 = vadd.f32 1.0, %v175_v6  ;;  %v180_v12 = vmul.f32 %v178_v7, %v124_v10 }
 0x105   :  { %v179_v11 = vmul.f32 %v177_v9, %v123_v8 }
 0x107   :  { %358 = vmatprep.mubr.msk.f32.mxu1 %vm191_vm3, %v179_v11 }
 0x108   :  { %359 = vmatmul.mubr.msk.f32.vlgmr.msra.gmra.mxu1 %vm191_vm3, %v180_v12 }
 0x1c8   :  { %v360_v14 = vpop.f32.mrf.mxu1 }
 0x1c9   :  { %v274_v16 = vadd.f32 %v360_v14, %v182_v13 }
 0x1ca   :  { %v264_v18 = vpop.f32.mrf.mxu1 }
 0x1cb   :  { %276 = vst.msk [vmem:[#allocation2 + $0x8] sm:$0xff] %vm25_vm0, %v274_v16  ;;  %v273_v19 = vadd.f32 %v264_v18, %v181_v15 }
 0x1cd   :  { %275 = vst.msk [vmem:[#allocation2] sm:$0xff] %vm25_vm0, %v273_v19 }
 0x1d2   :  { %v281_v17 = vld [vmem:[#allocation2 + $0x8] sm:$0xff] }
 0x1d3   :  { %v290_v21 = vadd.f32 %v314_v20, %v281_v17 }
 0x1d4   :  { %v280_v22 = vld [vmem:[#allocation2] sm:$0xff] }
 0x1d5   :  { %v289_v23 = vadd.f32 %v314_v20, %v280_v22  ;;  %292 = vst.msk [vmem:[#allocation3 + $0x8] sm:$0xff] %vm25_vm0, %v290_v21 }
 0x1d7   :  { %291 = vst.msk [vmem:[#allocation3] sm:$0xff] %vm25_vm0, %v289_v23 }
 0x1d8   :  { %385 = shalt.err (!%p382_p4)
}
 0x1d9   :  { %s399_s24 = smov 128   ;;  %s400_s4 = smov 8  }
 0x1da   :  { %304 = dma.vmem_to_hbm [thread:$0]  %s299_s22, 256, %s495_s5, [#allocation4], %s399_s24, %s399_s24, %s400_s4  }
 0x1db   :  { %394 = dma.done.wait [#allocation4], 256  }
 0x1dc   :  { %395 = vsyncadd [#allocation4], 4294967040 }
 0x1dd   :  { %308 = vsyncpa [#allocation4], 1 }

</bundles_post_ra>
